<compile_context>
chip_gen: v7x
topology: tpu7x:2x2x1
jax: 0.10.0
libtpu: 0.0.40
codegen_flags: <defaults>
</compile_context>

<pallas_src>
import functools
import math

import jax
import jax.numpy as jnp
from jax.experimental import pallas as pl
from jax.experimental.pallas import tpu as pltpu


def _round_up(v, m):
    return ((v + m - 1) // m) * m


def _pad2d(a, rows, cols):
    return jnp.pad(a, ((0, rows - a.shape[0]), (0, cols - a.shape[1])))


# --------------------------------------------------------------------------
# Fully fused forward pass (everything resident in VMEM, single pallas_call).
#   Y = ( A @ relu(A @ (X @ W1) + b1) @ W2 + b2 ) @ Wfc + bfc
# --------------------------------------------------------------------------
def _gcn_fused_kernel(a_ref, x_ref, w1_ref, b1_ref, w2_ref, b2_ref,
                      wfc_ref, bfc_ref, o_ref):
    bf16 = jnp.bfloat16
    a = a_ref[...]

    # Layer 1: H1 = relu(A @ (X @ W1) + b1)
    p1 = jnp.dot(x_ref[...], w1_ref[...], preferred_element_type=jnp.float32)
    h1 = jnp.dot(a, p1.astype(bf16), preferred_element_type=jnp.float32)
    h1 = jnp.maximum(h1 + b1_ref[...], 0.0)
    # Dropout(p=0.5) in eval mode == identity.

    # Layer 2: H2 = A @ (H1 @ W2) + b2
    p2 = jnp.dot(h1.astype(bf16), w2_ref[...], preferred_element_type=jnp.float32)
    h2 = jnp.dot(a, p2.astype(bf16), preferred_element_type=jnp.float32)
    h2 = h2 + b2_ref[...]

    # Classifier: Y = H2 @ Wfc + bfc  (f32, lane-dense padded output)
    y = jnp.dot(h2.astype(bf16), wfc_ref[...],
                preferred_element_type=jnp.float32) + bfc_ref[...]
    o_ref[...] = y


def gcn_forward_fused(a_p, x_p, w1_p, b1_p, w2_p, b2_p, wfc_p, bfc_p):
    n_p = a_p.shape[0]
    fin_p = x_p.shape[1]
    hid_p = w1_p.shape[1]
    cout_p = w2_p.shape[1]
    ncls_p = wfc_p.shape[1]

    return pl.pallas_call(
        _gcn_fused_kernel,
        out_shape=jax.ShapeDtypeStruct((n_p, ncls_p), jnp.float32),
        grid=(1,),
        in_specs=[
            pl.BlockSpec((n_p, n_p), lambda i: (0, 0)),      # A_hat (bf16)
            pl.BlockSpec((n_p, fin_p), lambda i: (0, 0)),    # X     (bf16)
            pl.BlockSpec((fin_p, hid_p), lambda i: (0, 0)),  # W1    (bf16)
            pl.BlockSpec((1, hid_p), lambda i: (0, 0)),      # b1    (f32)
            pl.BlockSpec((hid_p, cout_p), lambda i: (0, 0)), # W2    (bf16)
            pl.BlockSpec((1, cout_p), lambda i: (0, 0)),     # b2    (f32)
            pl.BlockSpec((cout_p, ncls_p), lambda i: (0, 0)),# Wfc   (bf16)
            pl.BlockSpec((1, ncls_p), lambda i: (0, 0)),     # bfc   (f32)
        ],
        out_specs=pl.BlockSpec((n_p, ncls_p), lambda i: (0, 0)),
        compiler_params=pltpu.CompilerParams(
            dimension_semantics=("arbitrary",)),
    )(a_p, x_p, w1_p, b1_p, w2_p, b2_p, wfc_p, bfc_p)


# --------------------------------------------------------------------------
# Tiled fallback, layer 1: O = act(A @ (X @ W) + b)
# Projection is computed on the fly per reduction tile (W resident), so the
# projected features never touch HBM.  f32 VMEM accumulator over k.
# --------------------------------------------------------------------------
def _agg_proj_kernel(a_ref, x_ref, w_ref, b_ref, o_ref, acc_ref, *, apply_relu):
    k = pl.program_id(1)

    @pl.when(k == 0)
    def _():
        acc_ref[...] = jnp.zeros_like(acc_ref)

    # On-the-fly projection of the k-th node slab: P_k = X_k @ W.
    p = jnp.dot(x_ref[...], w_ref[...],
                preferred_element_type=jnp.float32).astype(a_ref.dtype)
    acc_ref[...] += jnp.dot(a_ref[...], p, preferred_element_type=jnp.float32)

    @pl.when(k == pl.num_programs(1) - 1)
    def _():
        h = acc_ref[...] + b_ref[...]
        if apply_relu:
            h = jnp.maximum(h, 0.0)
        o_ref[...] = h.astype(o_ref.dtype)


def aggregate_project(a, x, w, b, *, apply_relu, tm, tk):
    n = a.shape[0]
    fin = x.shape[1]
    fout = w.shape[1]
    return pl.pallas_call(
        functools.partial(_agg_proj_kernel, apply_relu=apply_relu),
        out_shape=jax.ShapeDtypeStruct((n, fout), jnp.bfloat16),
        grid=(n // tm, n // tk),
        in_specs=[
            pl.BlockSpec((tm, tk), lambda i, k: (i, k)),     # A tile
            pl.BlockSpec((tk, fin), lambda i, k: (k, 0)),    # X node slab
            pl.BlockSpec((fin, fout), lambda i, k: (0, 0)),  # W (resident)
            pl.BlockSpec((1, fout), lambda i, k: (0, 0)),    # bias (f32)
        ],
        out_specs=pl.BlockSpec((tm, fout), lambda i, k: (i, 0)),
        scratch_shapes=[pltpu.VMEM((tm, fout), jnp.float32)],
        compiler_params=pltpu.CompilerParams(
            dimension_semantics=("parallel", "arbitrary")),
    )(a, x, w, b)


# --------------------------------------------------------------------------
# Tiled fallback, layer 2 + classifier: Y = (A @ (H1 @ W2) + b2) @ Wfc + bfc
# --------------------------------------------------------------------------
def _agg_proj_fc_kernel(a_ref, x_ref, w_ref, b_ref, wfc_ref, bfc_ref,
                        o_ref, acc_ref):
    k = pl.program_id(1)

    @pl.when(k == 0)
    def _():
        acc_ref[...] = jnp.zeros_like(acc_ref)

    p = jnp.dot(x_ref[...], w_ref[...],
                preferred_element_type=jnp.float32).astype(a_ref.dtype)
    acc_ref[...] += jnp.dot(a_ref[...], p, preferred_element_type=jnp.float32)

    @pl.when(k == pl.num_programs(1) - 1)
    def _():
        h2 = acc_ref[...] + b_ref[...]          # conv2 output (dropout = identity)
        y = jnp.dot(h2.astype(wfc_ref.dtype), wfc_ref[...],
                    preferred_element_type=jnp.float32) + bfc_ref[...]
        o_ref[...] = y


def aggregate_project_fc(a, x, w, b, wfc, bfc, *, tm, tk):
    n = a.shape[0]
    fin = x.shape[1]
    fout = w.shape[1]
    ncls = wfc.shape[1]
    return pl.pallas_call(
        _agg_proj_fc_kernel,
        out_shape=jax.ShapeDtypeStruct((n, ncls), jnp.float32),
        grid=(n // tm, n // tk),
        in_specs=[
            pl.BlockSpec((tm, tk), lambda i, k: (i, k)),     # A tile
            pl.BlockSpec((tk, fin), lambda i, k: (k, 0)),    # H1 node slab
            pl.BlockSpec((fin, fout), lambda i, k: (0, 0)),  # W2 (resident)
            pl.BlockSpec((1, fout), lambda i, k: (0, 0)),    # b2 (f32)
            pl.BlockSpec((fout, ncls), lambda i, k: (0, 0)), # Wfc (padded)
            pl.BlockSpec((1, ncls), lambda i, k: (0, 0)),    # bfc (padded)
        ],
        out_specs=pl.BlockSpec((tm, ncls), lambda i, k: (i, 0)),
        scratch_shapes=[pltpu.VMEM((tm, fout), jnp.float32)],
        compiler_params=pltpu.CompilerParams(
            dimension_semantics=("parallel", "arbitrary")),
    )(a, x, w, b, wfc, bfc)


# --------------------------------------------------------------------------
# Full forward pass wrapper.
# --------------------------------------------------------------------------
def gcn_forward(a_hat, x, w1, b1, w2, b2, wfc, bfc, *, tm=512, tk=512,
                fused_node_limit=2048):
    n, fin = x.shape
    hid = w1.shape[1]
    cout = w2.shape[1]
    ncls = wfc.shape[1]

    lane = 128
    fin_p = _round_up(fin, lane)
    hid_p = _round_up(hid, lane)
    cout_p = _round_up(cout, lane)
    ncls_p = _round_up(ncls, lane)

    use_fused = _round_up(n, lane) <= fused_node_limit
    if use_fused:
        n_p = _round_up(n, lane)
    else:
        # Robust grid math: pad to a common multiple of both tile sizes so
        # floor-division grids never drop rows/columns.
        n_p = _round_up(n, math.lcm(tm, tk))

    bf16, f32 = jnp.bfloat16, jnp.float32
    a_p = _pad2d(a_hat.astype(bf16), n_p, n_p)
    x_p = _pad2d(x.astype(bf16), n_p, fin_p)
    w1_p = _pad2d(w1.astype(bf16), fin_p, hid_p)
    w2_p = _pad2d(w2.astype(bf16), hid_p, cout_p)
    wfc_p = _pad2d(wfc.astype(bf16), cout_p, ncls_p)
    b1_p = _pad2d(b1.astype(f32), 1, hid_p)
    b2_p = _pad2d(b2.astype(f32), 1, cout_p)
    bfc_p = _pad2d(bfc.astype(f32), 1, ncls_p)

    if use_fused:
        y = gcn_forward_fused(a_p, x_p, w1_p, b1_p, w2_p, b2_p, wfc_p, bfc_p)
    else:
        h1 = aggregate_project(a_p, x_p, w1_p, b1_p, apply_relu=True,
                               tm=tm, tk=tk)                    # (n_p, hid_p)
        y = aggregate_project_fc(a_p, h1, w2_p, b2_p, wfc_p, bfc_p,
                                 tm=tm, tk=tk)                  # (n_p, ncls_p)
    return y[:n, :ncls]


def build_norm_adj(edge_index, num_nodes):
    """A_hat = D^{-1/2} (A + I) D^{-1/2}; edge_index[0]=src, edge_index[1]=dst.

    Note: .at[...].set dedupes repeated edges (same as PyG when edge_index has
    no duplicates and no pre-existing self-loops).
    """
    src, dst = edge_index[0], edge_index[1]
    a = jnp.zeros((num_nodes, num_nodes), jnp.float32).at[dst, src].set(1.0)
    a = a + jnp.eye(num_nodes, dtype=jnp.float32)
    deg = jnp.sum(a, axis=1)
    dinv = jax.lax.rsqrt(deg)  # deg >= 1 thanks to self-loops
    return a * dinv[:, None] * dinv[None, :]


if __name__ == "__main__":
    key = jax.random.PRNGKey(0)
    N = 8                 # number of graph nodes
    IN_CH = 16            # in_channels
    HID = 32              # hidden_channels
    OUT_CH = 16           # out_channels
    NUM_CLASSES = 2

    k_x, k_w1, k_b1, k_w2, k_b2, k_wfc, k_bfc = jax.random.split(key, 7)

    # Node features and a small deterministic graph (ring + chords), undirected.
    x = jax.random.normal(k_x, (N, IN_CH), dtype=jnp.float32)
    src = jnp.array([0, 1, 2, 3, 4, 5, 6, 7, 0, 3], dtype=jnp.int32)
    dst = jnp.array([1, 2, 3, 4, 5, 6, 7, 0, 4, 7], dtype=jnp.int32)
    edge_index = jnp.stack([jnp.concatenate([src, dst]),
                            jnp.concatenate([dst, src])])

    a_hat = build_norm_adj(edge_index, N)

    # Deterministic parameter initialization (shapes from GCN.__init__).
    w1 = jax.random.normal(k_w1, (IN_CH, HID), dtype=jnp.float32) * 0.1
    b1 = jax.random.normal(k_b1, (1, HID), dtype=jnp.float32) * 0.01
    w2 = jax.random.normal(k_w2, (HID, OUT_CH), dtype=jnp.float32) * 0.1
    b2 = jax.random.normal(k_b2, (1, OUT_CH), dtype=jnp.float32) * 0.01
    wfc = jax.random.normal(k_wfc, (OUT_CH, NUM_CLASSES), dtype=jnp.float32) * 0.1
    bfc = jax.random.normal(k_bfc, (1, NUM_CLASSES), dtype=jnp.float32) * 0.01

    # Pure-JAX f32 reference (kernels use bf16 operands / f32 accumulation, so
    # the tolerance is relaxed accordingly).
    h = jnp.maximum(a_hat @ (x @ w1) + b1, 0.0)
    h2 = a_hat @ (h @ w2) + b2
    ref = h2 @ wfc + bfc

    # 1) Fused single-kernel path (default at this size).
    out = gcn_forward(a_hat, x, w1, b1, w2, b2, wfc, bfc)
    out = jax.block_until_ready(out)
    assert out.shape == (N, NUM_CLASSES)
    assert jnp.allclose(out, ref, atol=2e-2, rtol=2e-2), "fused path mismatch"

    # 2) Tiled fallback path (forced), with a >1 reduction grid to exercise
    #    the k-accumulator.  tm=256, tk=128 -> n_p=256, grid=(1, 2).
    out_tiled = gcn_forward(a_hat, x, w1, b1, w2, b2, wfc, bfc,
                            tm=256, tk=128, fused_node_limit=0)
    out_tiled = jax.block_until_ready(out_tiled)
    assert out_tiled.shape == (N, NUM_CLASSES)
    assert jnp.allclose(out_tiled, ref, atol=2e-2, rtol=2e-2), "tiled path mismatch"

    print("KERNEL_OK")
</pallas_src>

<mosaic_0001>
module attributes {stable_mosaic.version = 11 : i64} {
  func.func @_gcn_fused_kernel(%arg0: i32, %arg1: memref<128x128xbf16, #tpu.memory_space<vmem>>, %arg2: memref<128x128xbf16, #tpu.memory_space<vmem>>, %arg3: memref<128x128xbf16, #tpu.memory_space<vmem>>, %arg4: memref<1x128xf32, #tpu.memory_space<vmem>>, %arg5: memref<128x128xbf16, #tpu.memory_space<vmem>>, %arg6: memref<1x128xf32, #tpu.memory_space<vmem>>, %arg7: memref<128x128xbf16, #tpu.memory_space<vmem>>, %arg8: memref<1x128xf32, #tpu.memory_space<vmem>>, %arg9: memref<128x128xf32, #tpu.memory_space<vmem>>) attributes {dimension_semantics = [#tpu.dimension_semantics<arbitrary>], iteration_bounds = array<i64: 1>, scalar_prefetch = 0 : i64, scratch_operands = 0 : i64, tpu.core_type = #tpu.core_type<tc>, window_params = [{pipeline_mode = #tpu.pipeline_mode<synchronous>, transform_indices = @transform_0, window_bounds = array<i64: 128, 128>}, {pipeline_mode = #tpu.pipeline_mode<synchronous>, transform_indices = @transform_1, window_bounds = array<i64: 128, 128>}, {pipeline_mode = #tpu.pipeline_mode<synchronous>, transform_indices = @transform_2, window_bounds = array<i64: 128, 128>}, {pipeline_mode = #tpu.pipeline_mode<synchronous>, transform_indices = @transform_3, window_bounds = array<i64: 1, 128>}, {pipeline_mode = #tpu.pipeline_mode<synchronous>, transform_indices = @transform_4, window_bounds = array<i64: 128, 128>}, {pipeline_mode = #tpu.pipeline_mode<synchronous>, transform_indices = @transform_5, window_bounds = array<i64: 1, 128>}, {pipeline_mode = #tpu.pipeline_mode<synchronous>, transform_indices = @transform_6, window_bounds = array<i64: 128, 128>}, {pipeline_mode = #tpu.pipeline_mode<synchronous>, transform_indices = @transform_7, window_bounds = array<i64: 1, 128>}, {pipeline_mode = #tpu.pipeline_mode<synchronous>, transform_indices = @transform_8, window_bounds = array<i64: 128, 128>}]} {
    %c0 = arith.constant 0 : index
    %c0_0 = arith.constant 0 : index
    %0 = vector.load %arg1[%c0, %c0_0] : memref<128x128xbf16, #tpu.memory_space<vmem>>, vector<128x128xbf16>
    %c0_1 = arith.constant 0 : index
    %c0_2 = arith.constant 0 : index
    %1 = vector.load %arg2[%c0_1, %c0_2] : memref<128x128xbf16, #tpu.memory_space<vmem>>, vector<128x128xbf16>
    %c0_3 = arith.constant 0 : index
    %c0_4 = arith.constant 0 : index
    %2 = vector.load %arg3[%c0_3, %c0_4] : memref<128x128xbf16, #tpu.memory_space<vmem>>, vector<128x128xbf16>
    %cst = arith.constant dense<0.000000e+00> : vector<128x128xf32>
    %3 = tpu.matmul %1, %2, %cst {dimension_numbers = #tpu.dot_dimension_numbers<[1], [0], [0], [1], [0, 0, 1, 1], [], []>} : vector<128x128xbf16>, vector<128x128xbf16>, vector<128x128xf32> -> vector<128x128xf32>
    %4 = arith.truncf %3 : vector<128x128xf32> to vector<128x128xbf16>
    %cst_5 = arith.constant dense<0.000000e+00> : vector<128x128xf32>
    %5 = tpu.matmul %0, %4, %cst_5 {dimension_numbers = #tpu.dot_dimension_numbers<[1], [0], [0], [1], [0, 0, 1, 1], [], []>} : vector<128x128xbf16>, vector<128x128xbf16>, vector<128x128xf32> -> vector<128x128xf32>
    %c0_6 = arith.constant 0 : index
    %c0_7 = arith.constant 0 : index
    %6 = vector.load %arg4[%c0_6, %c0_7] : memref<1x128xf32, #tpu.memory_space<vmem>>, vector<1x128xf32>
    %7 = vector.broadcast %6 : vector<1x128xf32> to vector<128x128xf32>
    %8 = arith.addf %5, %7 : vector<128x128xf32>
    %cst_8 = arith.constant 0.000000e+00 : f32
    %9 = vector.broadcast %cst_8 : f32 to vector<128x128xf32>
    %10 = arith.maximumf %8, %9 : vector<128x128xf32>
    %11 = arith.truncf %10 : vector<128x128xf32> to vector<128x128xbf16>
    %c0_9 = arith.constant 0 : index
    %c0_10 = arith.constant 0 : index
    %12 = vector.load %arg5[%c0_9, %c0_10] : memref<128x128xbf16, #tpu.memory_space<vmem>>, vector<128x128xbf16>
    %cst_11 = arith.constant dense<0.000000e+00> : vector<128x128xf32>
    %13 = tpu.matmul %11, %12, %cst_11 {dimension_numbers = #tpu.dot_dimension_numbers<[1], [0], [0], [1], [0, 0, 1, 1], [], []>} : vector<128x128xbf16>, vector<128x128xbf16>, vector<128x128xf32> -> vector<128x128xf32>
    %14 = arith.truncf %13 : vector<128x128xf32> to vector<128x128xbf16>
    %cst_12 = arith.constant dense<0.000000e+00> : vector<128x128xf32>
    %15 = tpu.matmul %0, %14, %cst_12 {dimension_numbers = #tpu.dot_dimension_numbers<[1], [0], [0], [1], [0, 0, 1, 1], [], []>} : vector<128x128xbf16>, vector<128x128xbf16>, vector<128x128xf32> -> vector<128x128xf32>
    %c0_13 = arith.constant 0 : index
    %c0_14 = arith.constant 0 : index
    %16 = vector.load %arg6[%c0_13, %c0_14] : memref<1x128xf32, #tpu.memory_space<vmem>>, vector<1x128xf32>
    %17 = vector.broadcast %16 : vector<1x128xf32> to vector<128x128xf32>
    %18 = arith.addf %15, %17 : vector<128x128xf32>
    %19 = arith.truncf %18 : vector<128x128xf32> to vector<128x128xbf16>
    %c0_15 = arith.constant 0 : index
    %c0_16 = arith.constant 0 : index
    %20 = vector.load %arg7[%c0_15, %c0_16] : memref<128x128xbf16, #tpu.memory_space<vmem>>, vector<128x128xbf16>
    %cst_17 = arith.constant dense<0.000000e+00> : vector<128x128xf32>
    %21 = tpu.matmul %19, %20, %cst_17 {dimension_numbers = #tpu.dot_dimension_numbers<[1], [0], [0], [1], [0, 0, 1, 1], [], []>} : vector<128x128xbf16>, vector<128x128xbf16>, vector<128x128xf32> -> vector<128x128xf32>
    %c0_18 = arith.constant 0 : index
    %c0_19 = arith.constant 0 : index
    %22 = vector.load %arg8[%c0_18, %c0_19] : memref<1x128xf32, #tpu.memory_space<vmem>>, vector<1x128xf32>
    %23 = vector.broadcast %22 : vector<1x128xf32> to vector<128x128xf32>
    %24 = arith.addf %21, %23 : vector<128x128xf32>
    %c0_20 = arith.constant 0 : index
    %c0_21 = arith.constant 0 : index
    %25 = vector.load %arg9[%c0_20, %c0_21] : memref<128x128xf32, #tpu.memory_space<vmem>>, vector<128x128xf32>
    tpu.vector_store %arg9[%c0_20, %c0_21], %24 {strides = array<i32>} : memref<128x128xf32, #tpu.memory_space<vmem>>, vector<128x128xf32>,
    return
  }
  func.func @transform_0(%arg0: i32) -> (i32, i32) {
    %c0_i32 = arith.constant 0 : i32
    %c0_i32_0 = arith.constant 0 : i32
    %c0_i32_1 = arith.constant 0 : i32
    return %c0_i32, %c0_i32_0 : i32, i32
  }
  func.func @transform_1(%arg0: i32) -> (i32, i32) {
    %c0_i32 = arith.constant 0 : i32
    %c0_i32_0 = arith.constant 0 : i32
    %c0_i32_1 = arith.constant 0 : i32
    return %c0_i32, %c0_i32_0 : i32, i32
  }
  func.func @transform_2(%arg0: i32) -> (i32, i32) {
    %c0_i32 = arith.constant 0 : i32
    %c0_i32_0 = arith.constant 0 : i32
    %c0_i32_1 = arith.constant 0 : i32
    return %c0_i32, %c0_i32_0 : i32, i32
  }
  func.func @transform_3(%arg0: i32) -> (i32, i32) {
    %c0_i32 = arith.constant 0 : i32
    %c0_i32_0 = arith.constant 0 : i32
    %c0_i32_1 = arith.constant 0 : i32
    return %c0_i32, %c0_i32_0 : i32, i32
  }
  func.func @transform_4(%arg0: i32) -> (i32, i32) {
    %c0_i32 = arith.constant 0 : i32
    %c0_i32_0 = arith.constant 0 : i32
    %c0_i32_1 = arith.constant 0 : i32
    return %c0_i32, %c0_i32_0 : i32, i32
  }
  func.func @transform_5(%arg0: i32) -> (i32, i32) {
    %c0_i32 = arith.constant 0 : i32
    %c0_i32_0 = arith.constant 0 : i32
    %c0_i32_1 = arith.constant 0 : i32
    return %c0_i32, %c0_i32_0 : i32, i32
  }
  func.func @transform_6(%arg0: i32) -> (i32, i32) {
    %c0_i32 = arith.constant 0 : i32
    %c0_i32_0 = arith.constant 0 : i32
    %c0_i32_1 = arith.constant 0 : i32
    return %c0_i32, %c0_i32_0 : i32, i32
  }
  func.func @transform_7(%arg0: i32) -> (i32, i32) {
    %c0_i32 = arith.constant 0 : i32
    %c0_i32_0 = arith.constant 0 : i32
    %c0_i32_1 = arith.constant 0 : i32
    return %c0_i32, %c0_i32_0 : i32, i32
  }
  func.func @transform_8(%arg0: i32) -> (i32, i32) {
    %c0_i32 = arith.constant 0 : i32
    %c0_i32_0 = arith.constant 0 : i32
    %c0_i32_1 = arith.constant 0 : i32
    return %c0_i32, %c0_i32_0 : i32, i32
  }
}

</mosaic_0001>

<bundles_post_ra>
// kernel: tpu_custom_call.1
= control target key start
LH: loop header
LB: loop body
LE: loop exit
PB: predicated region body
PF: predicated region fallthrough
CT: control target
= control target key end

     0   :  { %13 = vsyncpa [#allocation3], 0  ;;  %s1694_s0 = inlined_call_operand.hbm [shape: bf16[128,128], index: 0, kind: input, shape index: {}]   ;;  %s1695_s1 = inlined_call_operand.hbm [shape: bf16[128,128], index: 1, kind: input, shape index: {}]   ;;  %s1696_s2 = inlined_call_operand.hbm [shape: bf16[128,128], index: 2, kind: input, shape index: {}]   ;;  %s1697_s3 = inlined_call_operand.vmem [shape: f32[1,128], index: 3, kind: input, shape index: {}]   ;;  %s1698_s4 = inlined_call_operand.hbm [shape: bf16[128,128], index: 4, kind: input, shape index: {}]   ;;  %s1699_s5 = inlined_call_operand.vmem [shape: f32[1,128], index: 5, kind: input, shape index: {}]   ;;  %s1700_s6 = inlined_call_operand.hbm [shape: bf16[128,128], index: 6, kind: input, shape index: {}]   ;;  %s1701_s7 = inlined_call_operand.vmem [shape: f32[1,128], index: 7, kind: input, shape index: {}]   ;;  %s1702_s8 = inlined_call_operand.hbm [shape: f32[128,128], index: 8, kind: output, shape index: {}]  }
   0x1   :  { %14 = vsyncpa [#allocation6], 0 }
   0x2   :  { %15 = vsyncpa [#allocation9], 0 }
   0x3   :  { %16 = vsyncpa [#allocation4], 0  ;;  %s1497_s27 = smov [#allocation5]   ;;  %s1498_s29 = smov [#allocation8]  }
   0x4   :  { %s34_s28 = sshll.u32 %s1497_s27, 4  ;;  %s60_s30 = sshll.u32 %s1498_s29, 4  ;;  %s35_s28 = int_to_ptr.vmem [resolvable:$true] %s34_s28  ;;  %s1552_s30 = int_to_ptr.vmem [resolvable:$true] %s60_s30 }
   0x5   :  { %s1357_s11 = scalar_lea.hbm %s1695_s1, 1024 }
   0x6   :  { %p1358_p0 = scmp.ne.s32.totalorder %s1695_s1, %s1357_s11  ;;  %p1361_p1 = scmp.lt.u32.totalorder %s1357_s11, %s1695_s1 }
   0x8   :  { %p1363_p2 = pnand %p1361_p1, %p1358_p0 }
   0xa   :  { %1366 = shalt.err (!%p1363_p2)
}
   0xb   :  { %s1367_s16 = scalar_lea.vmem %s35_s28, 1024  ;;  %p1372_p4 = scmp.lt.s32.totalorder %s35_s28, %s35_s28 }
   0xc   :  { %p1368_p3 = scmp.ne.s32.totalorder %s35_s28, %s1367_s16  ;;  %p1373_p5 = scmp.lt.s32.totalorder %s1367_s16, %s1367_s16 }
   0xe   :  { %p1374_p6 = por %p1373_p5, %p1372_p4 }
  0x10   :  { %p1375_p7 = pnand %p1374_p6, %p1368_p3 }
  0x12   :  { %1378 = shalt.err (!%p1375_p7)
}
  0x13   :  { %s1499_s17 = smov 64   ;;  %s1500_s18 = smov 4  }
  0x14   :  { %40 = dma.hbm_to_vmem [thread:$0]  %s1695_s1, 1024, %s35_s28, [#allocation6], %s1499_s17, %s1499_s17, %s1500_s18  }
  0x15   :  { %s1379_s23 = scalar_lea.hbm %s1698_s4, 1024 }
  0x16   :  { %p1380_p8 = scmp.ne.s32.totalorder %s1698_s4, %s1379_s23  ;;  %p1383_p9 = scmp.lt.u32.totalorder %s1379_s23, %s1698_s4 }
  0x18   :  { %p1385_p10 = pnand %p1383_p9, %p1380_p8 }
  0x1a   :  { %1388 = shalt.err (!%p1385_p10)
}
  0x1b   :  { %s1389_s29 = scalar_lea.vmem %s1552_s30, 1024  ;;  %p1394_p12 = scmp.lt.s32.totalorder %s1552_s30, %s1552_s30 }
  0x1c   :  { %p1390_p11 = scmp.ne.s32.totalorder %s1552_s30, %s1389_s29  ;;  %p1395_p13 = scmp.lt.s32.totalorder %s1389_s29, %s1389_s29 }
  0x1e   :  { %p1396_p0 = por %p1395_p13, %p1394_p12 }
  0x20   :  { %p1397_p1 = pnand %p1396_p0, %p1390_p11 }
  0x22   :  { %1400 = shalt.err (!%p1397_p1)
}
  0x23   :  { %66 = dma.hbm_to_vmem [thread:$0]  %s1698_s4, 1024, %s1552_s30, [#allocation9], %s1499_s17, %s1499_s17, %s1500_s18  }
  0x24   :  { %s1501_s9 = smov [#allocation2]   ;;  %s1502_s11 = smov [#allocation7]  }
  0x25   :  { %s22_s10 = sshll.u32 %s1501_s9, 4  ;;  %s46_s12 = sshll.u32 %s1502_s11, 4  ;;  %s23_s10 = int_to_ptr.vmem [resolvable:$true] %s22_s10  ;;  %s1589_s12 = int_to_ptr.vmem [resolvable:$true] %s46_s12 }
  0x26   :  { %s1401_s15 = scalar_lea.hbm %s1694_s0, 1024 }
  0x27   :  { %p1402_p2 = scmp.ne.s32.totalorder %s1694_s0, %s1401_s15  ;;  %p1405_p3 = scmp.lt.u32.totalorder %s1401_s15, %s1694_s0 }
  0x29   :  { %p1407_p4 = pnand %p1405_p3, %p1402_p2 }
  0x2b   :  { %1410 = shalt.err (!%p1407_p4)
}
  0x2c   :  { %s1411_s4 = scalar_lea.vmem %s23_s10, 1024  ;;  %p1416_p6 = scmp.lt.s32.totalorder %s23_s10, %s23_s10 }
  0x2d   :  { %p1412_p5 = scmp.ne.s32.totalorder %s23_s10, %s1411_s4  ;;  %p1417_p7 = scmp.lt.s32.totalorder %s1411_s4, %s1411_s4 }
  0x2f   :  { %p1418_p8 = por %p1417_p7, %p1416_p6 }
  0x31   :  { %p1419_p9 = pnand %p1418_p8, %p1412_p5 }
  0x33   :  { %1422 = shalt.err (!%p1419_p9)
}
  0x34   :  { %28 = dma.hbm_to_vmem [thread:$0]  %s1694_s0, 1024, %s23_s10, [#allocation3], %s1499_s17, %s1499_s17, %s1500_s18  }
  0x35   :  { %s1423_s25 = scalar_lea.hbm %s1696_s2, 1024 }
  0x36   :  { %p1424_p10 = scmp.ne.s32.totalorder %s1696_s2, %s1423_s25  ;;  %p1427_p11 = scmp.lt.u32.totalorder %s1423_s25, %s1696_s2 }
  0x38   :  { %p1429_p12 = pnand %p1427_p11, %p1424_p10 }
  0x3a   :  { %1432 = shalt.err (!%p1429_p12)
}
  0x3b   :  { %s1433_s28 = scalar_lea.vmem %s1589_s12, 1024  ;;  %p1438_p0 = scmp.lt.s32.totalorder %s1589_s12, %s1589_s12 }
  0x3c   :  { %p1434_p13 = scmp.ne.s32.totalorder %s1589_s12, %s1433_s28  ;;  %p1439_p1 = scmp.lt.s32.totalorder %s1433_s28, %s1433_s28 }
  0x3e   :  { %p1440_p2 = por %p1439_p1, %p1438_p0 }
  0x40   :  { %p1441_p3 = pnand %p1440_p2, %p1434_p13 }
  0x42   :  { %1444 = shalt.err (!%p1441_p3)
}
  0x43   :  { %52 = dma.hbm_to_vmem [thread:$0]  %s1696_s2, 1024, %s1589_s12, [#allocation6], %s1499_s17, %s1499_s17, %s1500_s18  }
  0x44   :  { %s1503_s10 = smov [#allocation10]   ;;  %s1445_s15 = scalar_lea.hbm %s1700_s6, 1024 }
  0x45   :  { %s74_s11 = sshll.u32 %s1503_s10, 4  ;;  %p1446_p4 = scmp.ne.s32.totalorder %s1700_s6, %s1445_s15  ;;  %s75_s11 = int_to_ptr.vmem [resolvable:$true] %s74_s11 }
  0x46   :  { %p1449_p5 = scmp.lt.u32.totalorder %s1445_s15, %s1700_s6 }
  0x48   :  { %p1451_p6 = pnand %p1449_p5, %p1446_p4 }
  0x4a   :  { %1454 = shalt.err (!%p1451_p6)
}
  0x4b   :  { %s1455_s4 = scalar_lea.vmem %s75_s11, 1024  ;;  %p1460_p8 = scmp.lt.s32.totalorder %s75_s11, %s75_s11 }
  0x4c   :  { %p1456_p7 = scmp.ne.s32.totalorder %s75_s11, %s1455_s4  ;;  %p1461_p9 = scmp.lt.s32.totalorder %s1455_s4, %s1455_s4 }
  0x4e   :  { %p1462_p10 = por %p1461_p9, %p1460_p8 }
  0x50   :  { %p1463_p11 = pnand %p1462_p10, %p1456_p7 }
  0x52   :  { %1466 = shalt.err (!%p1463_p11)
}
  0x53   :  { %80 = dma.hbm_to_vmem [thread:$0]  %s1700_s6, 1024, %s75_s11, [#allocation9], %s1499_s17, %s1499_s17, %s1500_s18  }
  0x54   :  { %1489 = dma.done.wait [#allocation3], 1024  }
  0x55   :  { %1490 = vsyncadd [#allocation3], 4294966272 }
  0x56   :  { %1491 = dma.done.wait [#allocation6], 2048  }
  0x57   :  { %1492 = vsyncadd [#allocation6], 4294965248 }
  0x58   :  { %1493 = dma.done.wait [#allocation9], 2048  }
  0x59   :  { %1494 = vsyncadd [#allocation9], 4294965248  ;;  %v1317_v0 = vld [vmem:[#allocation7] sm:$0xff]   ;;  %v1318_v1 = vld [vmem:[#allocation7 + $0x8] sm:$0xff]  }
  0x5a   :  { %1131 = vmatprep.subr.bf16.mxu0 %v1317_v0  ;;  %v1319_v2 = vld [vmem:[#allocation7 + $0x10] sm:$0xff]   ;;  %v1320_v3 = vld [vmem:[#allocation7 + $0x18] sm:$0xff]   ;;  %v1325_v4 = vld [vmem:[#allocation5] sm:$0xff]  }
  0x5b   :  { %1132 = vmatpush3.bf16.msra.mxu0 %v1317_v0  ;;  %1147 = vmatprep.mubr.bf16.mxu0 %v1325_v4  ;;  %v1321_v5 = vld [vmem:[#allocation7 + $0x20] sm:$0xff]   ;;  %v1322_v6 = vld [vmem:[#allocation7 + $0x28] sm:$0xff]   ;;  %v1323_v7 = vld [vmem:[#allocation7 + $0x30] sm:$0xff]  }
  0x5c   :  { %1133 = vmatprep.subr.bf16.mxu0 %v1318_v1  ;;  %v1324_v8 = vld [vmem:[#allocation7 + $0x38] sm:$0xff]   ;;  %v1326_v9 = vld [vmem:[#allocation5 + $0x8] sm:$0xff]   ;;  %v1327_v10 = vld [vmem:[#allocation5 + $0x10] sm:$0xff]  }
  0x5d   :  { %v1328_v11 = vld [vmem:[#allocation5 + $0x18] sm:$0xff]   ;;  %v1329_v12 = vld [vmem:[#allocation5 + $0x20] sm:$0xff]   ;;  %v1330_v13 = vld [vmem:[#allocation5 + $0x28] sm:$0xff]  }
  0x5e   :  { %v1331_v14 = vld [vmem:[#allocation5 + $0x30] sm:$0xff]   ;;  %v1332_v15 = vld [vmem:[#allocation5 + $0x38] sm:$0xff]   ;;  %v1641_v16 = vld [vmem:[#allocation2] sm:$0xff]  }
  0x5f   :  { %1134 = vmatpush3.bf16.msra.mxu0 %v1318_v1  ;;  %1179 = vmatprep.mubr.bf16.mxu1 %v1641_v16  ;;  %v1341_v17 = vld [vmem:[#allocation8] sm:$0xff]   ;;  %v1342_v18 = vld [vmem:[#allocation8 + $0x8] sm:$0xff]   ;;  %v1343_v19 = vld [vmem:[#allocation8 + $0x10] sm:$0xff]  }
  0x60   :  { %1135 = vmatprep.subr.bf16.mxu0 %v1319_v2  ;;  %v1344_v20 = vld [vmem:[#allocation8 + $0x18] sm:$0xff]   ;;  %v1345_v21 = vld [vmem:[#allocation8 + $0x20] sm:$0xff]   ;;  %v1346_v22 = vld [vmem:[#allocation8 + $0x28] sm:$0xff]  }
  0x61   :  { %v1644_v47 = vld [vmem:[#allocation2 + $0x8] sm:$0xff]   ;;  %v1646_v48 = vld [vmem:[#allocation2 + $0x10] sm:$0xff]   ;;  %v1650_v49 = vld [vmem:[#allocation2 + $0x18] sm:$0xff]  }
  0x62   :  { %v1652_v50 = vld [vmem:[#allocation2 + $0x20] sm:$0xff]   ;;  %v1656_v51 = vld [vmem:[#allocation2 + $0x28] sm:$0xff]   ;;  %v1658_v52 = vld [vmem:[#allocation2 + $0x30] sm:$0xff]  }
  0x63   :  { %1136 = vmatpush3.bf16.msra.mxu0 %v1319_v2  ;;  %v1662_v53 = vld [vmem:[#allocation2 + $0x38] sm:$0xff]   ;;  %v1347_v54 = vld [vmem:[#allocation8 + $0x30] sm:$0xff]   ;;  %v1024_v56 = vld [vmem:[%s1697_s3] ss:$0 sm:$0xff] }
  0x64   :  { %1137 = vmatprep.subr.bf16.mxu0 %v1320_v3  ;;  %v1348_v55 = vld [vmem:[#allocation8 + $0x38] sm:$0xff]  }
  0x67   :  { %1138 = vmatpush3.bf16.msra.mxu0 %v1320_v3 }
  0x68   :  { %1139 = vmatprep.subr.bf16.mxu0 %v1321_v5 }
  0x6b   :  { %1140 = vmatpush3.bf16.msra.mxu0 %v1321_v5 }
  0x6c   :  { %1141 = vmatprep.subr.bf16.mxu0 %v1322_v6 }
  0x6f   :  { %1142 = vmatpush3.bf16.msra.mxu0 %v1322_v6 }
  0x70   :  { %1143 = vmatprep.subr.bf16.mxu0 %v1323_v7 }
  0x73   :  { %1144 = vmatpush3.bf16.msra.mxu0 %v1323_v7 }
  0x74   :  { %1145 = vmatprep.subr.bf16.mxu0 %v1324_v8 }
  0x77   :  { %1146 = vmatpush3.bf16.msra.mxu0 %v1324_v8 }
  0x78   :  { %1195 = vmatprep.subr.bf16.mxu0 %v1341_v17 }
  0x7a   :  { %1148 = vmatmul.mubr.bf16.vlgmr.msra.gmra.mrb[0].mxu0 %v1326_v9 }
  0x7b   :  { %1151 = vmatprep.mubr.bf16.mxu0 %v1327_v10  ;;  %1196 = vmatpush3.bf16.msra.mxu0 %v1341_v17 }
  0x7c   :  { %1197 = vmatprep.subr.bf16.mxu0 %v1342_v18 }
  0x7f   :  { %1198 = vmatpush3.bf16.msra.mxu0 %v1342_v18 }
  0x80   :  { %1199 = vmatprep.subr.bf16.mxu0 %v1343_v19 }
  0x82   :  { %1152 = vmatmul.mubr.bf16.gmra.mrb[4].mxu0 %v1328_v11 }
  0x83   :  { %1155 = vmatprep.mubr.bf16.mxu0 %v1329_v12  ;;  %1200 = vmatpush3.bf16.msra.mxu0 %v1343_v19 }
  0x84   :  { %1201 = vmatprep.subr.bf16.mxu0 %v1344_v20 }
  0x87   :  { %1202 = vmatpush3.bf16.msra.mxu0 %v1344_v20 }
  0x88   :  { %1203 = vmatprep.subr.bf16.mxu0 %v1345_v21 }
  0x8a   :  { %1156 = vmatmul.mubr.bf16.gmra.mrb[8].mxu0 %v1330_v13 }
  0x8b   :  { %1159 = vmatprep.mubr.bf16.mxu0 %v1331_v14  ;;  %1204 = vmatpush3.bf16.msra.mxu0 %v1345_v21 }
  0x8c   :  { %1205 = vmatprep.subr.bf16.mxu0 %v1346_v22 }
  0x8f   :  { %1206 = vmatpush3.bf16.msra.mxu0 %v1346_v22 }
  0x90   :  { %1207 = vmatprep.subr.bf16.mxu0 %v1347_v54 }
  0x92   :  { %1160 = vmatmul.mubr.bf16.gmra.mrb[12].mxu0 %v1332_v15 }
  0x93   :  { %1208 = vmatpush3.bf16.msra.mxu0 %v1347_v54 }
  0x94   :  { %1209 = vmatprep.subr.bf16.mxu0 %v1348_v55 }
  0x97   :  { %1210 = vmatpush3.bf16.msra.mxu0 %v1348_v55 }
 0x14d   :  { %v1149_v23 = vpop.f32.mrb[0].mxu0 }
 0x14e   :  { %v277_v24 = vpop.f32.mrb[1].mxu0 }
 0x14f   :  { %v1150_v25 = vpop.f32.mrb[2].mxu0 }
 0x150   :  { %v341_v26 = vpack.c.bf16 %v1150_v25, %v1149_v23  ;;  %v280_v27 = vpop.f32.mrb[3].mxu0 }
 0x151   :  { %v340_v28 = vpack.c.bf16 %v280_v27, %v277_v24 }
 0x153   :  { %1163 = vmatprep.subr.bf16.mxu1 %v340_v28 }
 0x154   :  { %1164 = vmatpush3.bf16.msra.mxu1 %v340_v28 }
 0x155   :  { %v1153_v29 = vpop.f32.mrb[4].mxu0  ;;  %1165 = vmatprep.subr.bf16.mxu1 %v341_v26 }
 0x156   :  { %v293_v30 = vpop.f32.mrb[5].mxu0 }
 0x157   :  { %v1154_v31 = vpop.f32.mrb[6].mxu0 }
 0x158   :  { %v343_v32 = vpack.c.bf16 %v1154_v31, %v1153_v29  ;;  %v296_v33 = vpop.f32.mrb[7].mxu0  ;;  %1166 = vmatpush3.bf16.msra.mxu1 %v341_v26 }
 0x159   :  { %v342_v34 = vpack.c.bf16 %v296_v33, %v293_v30 }
 0x15b   :  { %1167 = vmatprep.subr.bf16.mxu1 %v342_v34 }
 0x15c   :  { %1168 = vmatpush3.bf16.msra.mxu1 %v342_v34 }
 0x15d   :  { %v1157_v35 = vpop.f32.mrb[8].mxu0  ;;  %1169 = vmatprep.subr.bf16.mxu1 %v343_v32 }
 0x15e   :  { %v309_v36 = vpop.f32.mrb[9].mxu0 }
 0x15f   :  { %v1158_v37 = vpop.f32.mrb[10].mxu0 }
 0x160   :  { %v345_v38 = vpack.c.bf16 %v1158_v37, %v1157_v35  ;;  %v312_v39 = vpop.f32.mrb[11].mxu0  ;;  %1170 = vmatpush3.bf16.msra.mxu1 %v343_v32 }
 0x161   :  { %v344_v40 = vpack.c.bf16 %v312_v39, %v309_v36 }
 0x163   :  { %1171 = vmatprep.subr.bf16.mxu1 %v344_v40 }
 0x164   :  { %1172 = vmatpush3.bf16.msra.mxu1 %v344_v40 }
 0x165   :  { %v1161_v41 = vpop.f32.mrb[12].mxu0  ;;  %1173 = vmatprep.subr.bf16.mxu1 %v345_v38 }
 0x166   :  { %v325_v42 = vpop.f32.mrb[13].mxu0 }
 0x167   :  { %v1162_v43 = vpop.f32.mrb[14].mxu0 }
 0x168   :  { %v347_v44 = vpack.c.bf16 %v1162_v43, %v1161_v41  ;;  %v328_v45 = vpop.f32.mrb[15].mxu0  ;;  %1174 = vmatpush3.bf16.msra.mxu1 %v345_v38 }
 0x169   :  { %v346_v46 = vpack.c.bf16 %v328_v45, %v325_v42 }
 0x16b   :  { %1175 = vmatprep.subr.bf16.mxu1 %v346_v46 }
 0x16c   :  { %1176 = vmatpush3.bf16.msra.mxu1 %v346_v46 }
 0x16d   :  { %1177 = vmatprep.subr.bf16.mxu1 %v347_v44 }
 0x170   :  { %1178 = vmatpush3.bf16.msra.mxu1 %v347_v44 }
 0x173   :  { %1180 = vmatmul.mubr.bf16.vlgmr.msra.gmra.mrb[0].mxu1 %v1644_v47 }
 0x174   :  { %1183 = vmatprep.mubr.bf16.mxu1 %v1646_v48 }
 0x17b   :  { %1184 = vmatmul.mubr.bf16.gmra.mrb[4].mxu1 %v1650_v49 }
 0x17c   :  { %1187 = vmatprep.mubr.bf16.mxu1 %v1652_v50 }
 0x183   :  { %1188 = vmatmul.mubr.bf16.gmra.mrb[8].mxu1 %v1656_v51 }
 0x184   :  { %1191 = vmatprep.mubr.bf16.mxu1 %v1658_v52 }
 0x18b   :  { %1192 = vmatmul.mubr.bf16.gmra.mrb[12].mxu1 %v1662_v53 }
 0x18c   :  { %1243 = vmatprep.mubr.bf16.mxu1 %v1641_v16 }
 0x246   :  { %v1181_v57 = vpop.f32.mrb[0].mxu1 }
 0x247   :  { %v446_v58 = vadd.f32 %v1181_v57, %v1024_v56  ;;  %v437_v59 = vpop.f32.mrb[1].mxu1  ;;  %v1349_v57 = vld [vmem:[#allocation10] sm:$0xff]  }
 0x248   :  { %v438_v60 = vadd.f32 %v1024_v56, %v437_v59  ;;  %v1182_v61 = vpop.f32.mrb[2].mxu1  ;;  %1259 = vmatprep.subr.bf16.mxu0 %v1349_v57  ;;  %v1351_v59 = vld [vmem:[#allocation10 + $0x10] sm:$0xff]  }
 0x249   :  { %v449_v62 = vadd.f32 %v1182_v61, %v1024_v56  ;;  %v440_v63 = vpop.f32.mrb[3].mxu1  ;;  %v502_v1 = vmax.f32 %v446_v58, 0.0  ;;  %v1350_v58 = vld [vmem:[#allocation10 + $0x8] sm:$0xff]  }
 0x24a   :  { %v441_v0 = vadd.f32 %v1024_v56, %v440_v63  ;;  %v500_v3 = vmax.f32 %v438_v60, 0.0  ;;  %v1352_v60 = vld [vmem:[#allocation10 + $0x18] sm:$0xff]   ;;  %v1354_v61 = vld [vmem:[#allocation10 + $0x28] sm:$0xff]  }
 0x24b   :  { %v503_v2 = vmax.f32 %v449_v62, 0.0 }
 0x24c   :  { %v501_v4 = vmax.f32 %v441_v0, 0.0 }
 0x24d   :  { %v517_v5 = vpack.c.bf16 %v503_v2, %v502_v1 }
 0x24e   :  { %v516_v6 = vpack.c.bf16 %v501_v4, %v500_v3  ;;  %v1185_v7 = vpop.f32.mrb[4].mxu1 }
 0x24f   :  { %v462_v8 = vadd.f32 %v1185_v7, %v1024_v56  ;;  %v453_v9 = vpop.f32.mrb[5].mxu1 }
 0x250   :  { %v454_v10 = vadd.f32 %v1024_v56, %v453_v9  ;;  %v1186_v11 = vpop.f32.mrb[6].mxu1  ;;  %1211 = vmatprep.mubr.bf16.mxu0 %v516_v6 }
 0x251   :  { %v465_v12 = vadd.f32 %v1186_v11, %v1024_v56  ;;  %v456_v13 = vpop.f32.mrb[7].mxu1  ;;  %1212 = vmatmul.mubr.bf16.vlgmr.msra.gmra.mrb[16].mxu0 %v517_v5  ;;  %v506_v15 = vmax.f32 %v462_v8, 0.0 }
 0x252   :  { %v457_v14 = vadd.f32 %v1024_v56, %v456_v13  ;;  %v504_v17 = vmax.f32 %v454_v10, 0.0  ;;  %1260 = vmatpush3.bf16.msra.mxu0 %v1349_v57 }
 0x253   :  { %v507_v16 = vmax.f32 %v465_v12, 0.0  ;;  %1261 = vmatprep.subr.bf16.mxu0 %v1350_v58 }
 0x254   :  { %v505_v18 = vmax.f32 %v457_v14, 0.0 }
 0x255   :  { %v519_v19 = vpack.c.bf16 %v507_v16, %v506_v15 }
 0x256   :  { %v518_v20 = vpack.c.bf16 %v505_v18, %v504_v17  ;;  %v1189_v21 = vpop.f32.mrb[8].mxu1  ;;  %1262 = vmatpush3.bf16.msra.mxu0 %v1350_v58 }
 0x257   :  { %v478_v22 = vadd.f32 %v1189_v21, %v1024_v56  ;;  %v469_v23 = vpop.f32.mrb[9].mxu1  ;;  %1263 = vmatprep.subr.bf16.mxu0 %v1351_v59 }
 0x258   :  { %v470_v24 = vadd.f32 %v1024_v56, %v469_v23  ;;  %v1190_v25 = vpop.f32.mrb[10].mxu1  ;;  %1215 = vmatprep.mubr.bf16.mxu0 %v518_v20 }
 0x259   :  { %v481_v26 = vadd.f32 %v1190_v25, %v1024_v56  ;;  %v472_v27 = vpop.f32.mrb[11].mxu1  ;;  %1216 = vmatmul.mubr.bf16.gmra.mrb[20].mxu0 %v519_v19  ;;  %v510_v29 = vmax.f32 %v478_v22, 0.0 }
 0x25a   :  { %v473_v28 = vadd.f32 %v1024_v56, %v472_v27  ;;  %v508_v31 = vmax.f32 %v470_v24, 0.0  ;;  %1264 = vmatpush3.bf16.msra.mxu0 %v1351_v59 }
 0x25b   :  { %v511_v30 = vmax.f32 %v481_v26, 0.0  ;;  %1265 = vmatprep.subr.bf16.mxu0 %v1352_v60 }
 0x25c   :  { %v509_v32 = vmax.f32 %v473_v28, 0.0 }
 0x25d   :  { %v521_v33 = vpack.c.bf16 %v511_v30, %v510_v29 }
 0x25e   :  { %v520_v34 = vpack.c.bf16 %v509_v32, %v508_v31  ;;  %v1193_v35 = vpop.f32.mrb[12].mxu1  ;;  %1266 = vmatpush3.bf16.msra.mxu0 %v1352_v60 }
 0x25f   :  { %v494_v36 = vadd.f32 %v1193_v35, %v1024_v56  ;;  %v485_v37 = vpop.f32.mrb[13].mxu1 }
 0x260   :  { %v486_v38 = vadd.f32 %v1024_v56, %v485_v37  ;;  %v1194_v39 = vpop.f32.mrb[14].mxu1  ;;  %1219 = vmatprep.mubr.bf16.mxu0 %v520_v34 }
 0x261   :  { %v497_v40 = vadd.f32 %v1194_v39, %v1024_v56  ;;  %v488_v41 = vpop.f32.mrb[15].mxu1  ;;  %1220 = vmatmul.mubr.bf16.gmra.mrb[24].mxu0 %v521_v33  ;;  %v514_v43 = vmax.f32 %v494_v36, 0.0 }
 0x262   :  { %v489_v42 = vadd.f32 %v1024_v56, %v488_v41  ;;  %v512_v45 = vmax.f32 %v486_v38, 0.0  ;;  %v1353_v56 = vld [vmem:[#allocation10 + $0x20] sm:$0xff]  }
 0x263   :  { %v515_v44 = vmax.f32 %v497_v40, 0.0  ;;  %1267 = vmatprep.subr.bf16.mxu0 %v1353_v56 }
 0x264   :  { %v513_v46 = vmax.f32 %v489_v42, 0.0  ;;  %1268 = vmatpush3.bf16.msra.mxu0 %v1353_v56 }
 0x265   :  { %v523_v54 = vpack.c.bf16 %v515_v44, %v514_v43  ;;  %1269 = vmatprep.subr.bf16.mxu0 %v1354_v61 }
 0x266   :  { %v522_v55 = vpack.c.bf16 %v513_v46, %v512_v45 }
 0x268   :  { %1223 = vmatprep.mubr.bf16.mxu0 %v522_v55  ;;  %1270 = vmatpush3.bf16.msra.mxu0 %v1354_v61 }
 0x269   :  { %1224 = vmatmul.mubr.bf16.gmra.mrb[28].mxu0 %v523_v54 }
 0x324   :  { %v1213_v62 = vpop.f32.mrb[16].mxu0 }
 0x325   :  { %v622_v63 = vpop.f32.mrb[17].mxu0 }
 0x326   :  { %v1214_v0 = vpop.f32.mrb[18].mxu0 }
 0x327   :  { %v686_v1 = vpack.c.bf16 %v1214_v0, %v1213_v62  ;;  %v625_v2 = vpop.f32.mrb[19].mxu0 }
 0x328   :  { %v685_v3 = vpack.c.bf16 %v625_v2, %v622_v63 }
 0x32a   :  { %1227 = vmatprep.subr.bf16.mxu1 %v685_v3 }
 0x32b   :  { %1228 = vmatpush3.bf16.msra.mxu1 %v685_v3 }
 0x32c   :  { %v1217_v4 = vpop.f32.mrb[20].mxu0  ;;  %1229 = vmatprep.subr.bf16.mxu1 %v686_v1 }
 0x32d   :  { %v638_v5 = vpop.f32.mrb[21].mxu0 }
 0x32e   :  { %v1218_v6 = vpop.f32.mrb[22].mxu0 }
 0x32f   :  { %v688_v7 = vpack.c.bf16 %v1218_v6, %v1217_v4  ;;  %v641_v8 = vpop.f32.mrb[23].mxu0  ;;  %1230 = vmatpush3.bf16.msra.mxu1 %v686_v1  ;;  %v1042_v1 = vld [vmem:[%s1701_s7] ss:$0 sm:$0xff]  ;;  %s1504_s7 = smov [#allocation11]  }
 0x330   :  { %v687_v9 = vpack.c.bf16 %v641_v8, %v638_v5  ;;  %s994_s22 = sshll.u32 %s1504_s7, 4  ;;  %s995_s22 = int_to_ptr.vmem [resolvable:$true] %s994_s22 }
 0x331   :  { %s1467_s23 = scalar_lea.vmem %s995_s22, 2048  ;;  %p1472_p13 = scmp.lt.s32.totalorder %s995_s22, %s995_s22 }
 0x332   :  { %1231 = vmatprep.subr.bf16.mxu1 %v687_v9  ;;  %p1468_p12 = scmp.ne.s32.totalorder %s995_s22, %s1467_s23  ;;  %p1473_p0 = scmp.lt.s32.totalorder %s1467_s23, %s1467_s23 }
 0x333   :  { %1232 = vmatpush3.bf16.msra.mxu1 %v687_v9 }
 0x334   :  { %v1221_v10 = vpop.f32.mrb[24].mxu0  ;;  %1233 = vmatprep.subr.bf16.mxu1 %v688_v7  ;;  %p1474_p1 = por %p1473_p0, %p1472_p13 }
 0x335   :  { %v654_v11 = vpop.f32.mrb[25].mxu0 }
 0x336   :  { %v1222_v12 = vpop.f32.mrb[26].mxu0  ;;  %p1475_p2 = pnand %p1474_p1, %p1468_p12 }
 0x337   :  { %v690_v13 = vpack.c.bf16 %v1222_v12, %v1221_v10  ;;  %v657_v14 = vpop.f32.mrb[27].mxu0  ;;  %1234 = vmatpush3.bf16.msra.mxu1 %v688_v7 }
 0x338   :  { %v689_v15 = vpack.c.bf16 %v657_v14, %v654_v11 }
 0x33a   :  { %1235 = vmatprep.subr.bf16.mxu1 %v689_v15 }
 0x33b   :  { %1236 = vmatpush3.bf16.msra.mxu1 %v689_v15 }
 0x33c   :  { %v1225_v16 = vpop.f32.mrb[28].mxu0  ;;  %1237 = vmatprep.subr.bf16.mxu1 %v690_v13 }
 0x33d   :  { %v670_v17 = vpop.f32.mrb[29].mxu0 }
 0x33e   :  { %v1226_v18 = vpop.f32.mrb[30].mxu0 }
 0x33f   :  { %v692_v19 = vpack.c.bf16 %v1226_v18, %v1225_v16  ;;  %v673_v20 = vpop.f32.mrb[31].mxu0  ;;  %1238 = vmatpush3.bf16.msra.mxu1 %v690_v13 }
 0x340   :  { %v691_v21 = vpack.c.bf16 %v673_v20, %v670_v17 }
 0x342   :  { %1239 = vmatprep.subr.bf16.mxu1 %v691_v21 }
 0x343   :  { %1240 = vmatpush3.bf16.msra.mxu1 %v691_v21 }
 0x344   :  { %1241 = vmatprep.subr.bf16.mxu1 %v692_v19 }
 0x347   :  { %1242 = vmatpush3.bf16.msra.mxu1 %v692_v19 }
 0x348   :  { %1291 = vmatprep.subr.bf16.mxu1 %v1349_v57 }
 0x34a   :  { %1244 = vmatmul.mubr.bf16.vlgmr.msra.gmra.mrb[16].mxu1 %v1644_v47  ;;  %v1355_v47 = vld [vmem:[#allocation10 + $0x30] sm:$0xff]  }
 0x34b   :  { %1247 = vmatprep.mubr.bf16.mxu1 %v1646_v48  ;;  %1299 = vmatpush3.bf16.msra.mxu1 %v1349_v57  ;;  %v1356_v48 = vld [vmem:[#allocation10 + $0x38] sm:$0xff]  }
 0x34c   :  { %1292 = vmatprep.subr.bf16.mxu1 %v1350_v58  ;;  %1271 = vmatprep.subr.bf16.mxu0 %v1355_v47 }
 0x34d   :  { %1272 = vmatpush3.bf16.msra.mxu0 %v1355_v47 }
 0x34e   :  { %1273 = vmatprep.subr.bf16.mxu0 %v1356_v48 }
 0x34f   :  { %1300 = vmatpush3.bf16.msra.mxu1 %v1350_v58 }
 0x350   :  { %1293 = vmatprep.subr.bf16.mxu1 %v1351_v59 }
 0x351   :  { %1274 = vmatpush3.bf16.msra.mxu0 %v1356_v48 }
 0x352   :  { %1248 = vmatmul.mubr.bf16.gmra.mrb[20].mxu1 %v1650_v49 }
 0x353   :  { %1251 = vmatprep.mubr.bf16.mxu1 %v1652_v50  ;;  %1301 = vmatpush3.bf16.msra.mxu1 %v1351_v59  ;;  %v1041_v50 = vld [vmem:[%s1699_s5] ss:$0 sm:$0xff] }
 0x354   :  { %1294 = vmatprep.subr.bf16.mxu1 %v1352_v60 }
 0x357   :  { %1302 = vmatpush3.bf16.msra.mxu1 %v1352_v60 }
 0x358   :  { %1295 = vmatprep.subr.bf16.mxu1 %v1353_v56 }
 0x35a   :  { %1252 = vmatmul.mubr.bf16.gmra.mrb[24].mxu1 %v1656_v51 }
 0x35b   :  { %1255 = vmatprep.mubr.bf16.mxu1 %v1658_v52  ;;  %1303 = vmatpush3.bf16.msra.mxu1 %v1353_v56 }
 0x35c   :  { %1296 = vmatprep.subr.bf16.mxu1 %v1354_v61 }
 0x35f   :  { %1304 = vmatpush3.bf16.msra.mxu1 %v1354_v61 }
 0x360   :  { %1297 = vmatprep.subr.bf16.mxu1 %v1355_v47 }
 0x362   :  { %1256 = vmatmul.mubr.bf16.gmra.mrb[28].mxu1 %v1662_v53 }
 0x363   :  { %1305 = vmatpush3.bf16.msra.mxu1 %v1355_v47 }
 0x364   :  { %1298 = vmatprep.subr.bf16.mxu1 %v1356_v48 }
 0x367   :  { %1306 = vmatpush3.bf16.msra.mxu1 %v1356_v48 }
 0x41d   :  { %v1245_v49 = vpop.f32.mrb[16].mxu1 }
 0x41e   :  { %v734_v51 = vpop.f32.mrb[17].mxu1  ;;  %v743_v22 = vadd.f32 %v1245_v49, %v1041_v50 }
 0x41f   :  { %v1246_v52 = vpop.f32.mrb[18].mxu1  ;;  %v735_v24 = vadd.f32 %v1041_v50, %v734_v51 }
 0x420   :  { %v746_v23 = vadd.f32 %v1246_v52, %v1041_v50  ;;  %v737_v53 = vpop.f32.mrb[19].mxu1 }
 0x421   :  { %v738_v25 = vadd.f32 %v1041_v50, %v737_v53 }
 0x422   :  { %v798_v26 = vpack.c.bf16 %v746_v23, %v743_v22 }
 0x423   :  { %v797_v27 = vpack.c.bf16 %v738_v25, %v735_v24 }
 0x425   :  { %v1249_v28 = vpop.f32.mrb[20].mxu1  ;;  %1275 = vmatprep.mubr.bf16.mxu0 %v797_v27 }
 0x426   :  { %v750_v29 = vpop.f32.mrb[21].mxu1  ;;  %1276 = vmatmul.mubr.bf16.vlgmr.msra.gmra.mrb[32].mxu0 %v798_v26  ;;  %v759_v31 = vadd.f32 %v1249_v28, %v1041_v50 }
 0x427   :  { %v1250_v30 = vpop.f32.mrb[22].mxu1  ;;  %v751_v34 = vadd.f32 %v1041_v50, %v750_v29 }
 0x428   :  { %v762_v32 = vadd.f32 %v1250_v30, %v1041_v50  ;;  %v753_v33 = vpop.f32.mrb[23].mxu1 }
 0x429   :  { %v754_v35 = vadd.f32 %v1041_v50, %v753_v33 }
 0x42a   :  { %v800_v36 = vpack.c.bf16 %v762_v32, %v759_v31 }
 0x42b   :  { %v799_v37 = vpack.c.bf16 %v754_v35, %v751_v34 }
 0x42d   :  { %v1253_v38 = vpop.f32.mrb[24].mxu1  ;;  %1279 = vmatprep.mubr.bf16.mxu0 %v799_v37 }
 0x42e   :  { %v766_v39 = vpop.f32.mrb[25].mxu1  ;;  %1280 = vmatmul.mubr.bf16.gmra.mrb[36].mxu0 %v800_v36  ;;  %v775_v41 = vadd.f32 %v1253_v38, %v1041_v50 }
 0x42f   :  { %v1254_v40 = vpop.f32.mrb[26].mxu1  ;;  %v767_v44 = vadd.f32 %v1041_v50, %v766_v39 }
 0x430   :  { %v778_v42 = vadd.f32 %v1254_v40, %v1041_v50  ;;  %v769_v43 = vpop.f32.mrb[27].mxu1 }
 0x431   :  { %v770_v45 = vadd.f32 %v1041_v50, %v769_v43 }
 0x432   :  { %v802_v46 = vpack.c.bf16 %v778_v42, %v775_v41 }
 0x433   :  { %v801_v54 = vpack.c.bf16 %v770_v45, %v767_v44 }
 0x435   :  { %v1257_v55 = vpop.f32.mrb[28].mxu1  ;;  %1283 = vmatprep.mubr.bf16.mxu1 %v801_v54 }
 0x436   :  { %v782_v57 = vpop.f32.mrb[29].mxu1  ;;  %1284 = vmatmul.mubr.bf16.vlgmr.msra.gmra.mrb[32].mxu1 %v802_v46  ;;  %v791_v59 = vadd.f32 %v1257_v55, %v1041_v50 }
 0x437   :  { %v1258_v58 = vpop.f32.mrb[30].mxu1  ;;  %v783_v61 = vadd.f32 %v1041_v50, %v782_v57 }
 0x438   :  { %v794_v60 = vadd.f32 %v1258_v58, %v1041_v50  ;;  %v785_v56 = vpop.f32.mrb[31].mxu1 }
 0x439   :  { %v786_v62 = vadd.f32 %v1041_v50, %v785_v56 }
 0x43a   :  { %v804_v63 = vpack.c.bf16 %v794_v60, %v791_v59 }
 0x43b   :  { %v803_v0 = vpack.c.bf16 %v786_v62, %v783_v61 }
 0x43d   :  { %1287 = vmatprep.mubr.bf16.mxu1 %v803_v0 }
 0x43e   :  { %1288 = vmatmul.mubr.bf16.gmra.mrb[36].mxu1 %v804_v63 }
 0x4f9   :  { %v1277_v2 = vpop.f32.mrb[32].mxu0 }
 0x4fa   :  { %v919_v3 = vadd.f32 %v1277_v2, %v1042_v1  ;;  %v910_v4 = vpop.f32.mrb[33].mxu0 }
 0x4fb   :  { %v911_v5 = vadd.f32 %v1042_v1, %v910_v4  ;;  %v1278_v6 = vpop.f32.mrb[34].mxu0 }
 0x4fc   :  { %975 = vst [vmem:[#allocation11 + $0x10] sm:$0xff] %v919_v3  ;;  %v922_v7 = vadd.f32 %v1278_v6, %v1042_v1  ;;  %v913_v8 = vpop.f32.mrb[35].mxu0 }
 0x4fd   :  { %973 = vst [vmem:[#allocation11] sm:$0xff] %v911_v5  ;;  %v914_v9 = vadd.f32 %v1042_v1, %v913_v8 }
 0x4fe   :  { %976 = vst [vmem:[#allocation11 + $0x18] sm:$0xff] %v922_v7 }
 0x4ff   :  { %974 = vst [vmem:[#allocation11 + $0x8] sm:$0xff] %v914_v9 }
 0x501   :  { %v1281_v10 = vpop.f32.mrb[36].mxu0 }
 0x502   :  { %v935_v11 = vadd.f32 %v1281_v10, %v1042_v1  ;;  %v926_v12 = vpop.f32.mrb[37].mxu0 }
 0x503   :  { %v927_v13 = vadd.f32 %v1042_v1, %v926_v12  ;;  %v1282_v14 = vpop.f32.mrb[38].mxu0 }
 0x504   :  { %979 = vst [vmem:[#allocation11 + $0x30] sm:$0xff] %v935_v11  ;;  %v938_v15 = vadd.f32 %v1282_v14, %v1042_v1  ;;  %v929_v16 = vpop.f32.mrb[39].mxu0 }
 0x505   :  { %977 = vst [vmem:[#allocation11 + $0x20] sm:$0xff] %v927_v13  ;;  %v930_v17 = vadd.f32 %v1042_v1, %v929_v16 }
 0x506   :  { %980 = vst [vmem:[#allocation11 + $0x38] sm:$0xff] %v938_v15 }
 0x507   :  { %978 = vst [vmem:[#allocation11 + $0x28] sm:$0xff] %v930_v17 }
 0x509   :  { %v1285_v18 = vpop.f32.mrb[32].mxu1 }
 0x50a   :  { %v951_v19 = vadd.f32 %v1285_v18, %v1042_v1  ;;  %v942_v20 = vpop.f32.mrb[33].mxu1 }
 0x50b   :  { %v943_v21 = vadd.f32 %v1042_v1, %v942_v20  ;;  %v1286_v47 = vpop.f32.mrb[34].mxu1 }
 0x50c   :  { %983 = vst [vmem:[#allocation11 + $0x50] sm:$0xff] %v951_v19  ;;  %v954_v48 = vadd.f32 %v1286_v47, %v1042_v1  ;;  %v945_v49 = vpop.f32.mrb[35].mxu1 }
 0x50d   :  { %981 = vst [vmem:[#allocation11 + $0x40] sm:$0xff] %v943_v21  ;;  %v946_v50 = vadd.f32 %v1042_v1, %v945_v49 }
 0x50e   :  { %984 = vst [vmem:[#allocation11 + $0x58] sm:$0xff] %v954_v48 }
 0x50f   :  { %982 = vst [vmem:[#allocation11 + $0x48] sm:$0xff] %v946_v50 }
 0x511   :  { %v1289_v51 = vpop.f32.mrb[36].mxu1 }
 0x512   :  { %v967_v52 = vadd.f32 %v1289_v51, %v1042_v1  ;;  %v958_v22 = vpop.f32.mrb[37].mxu1 }
 0x513   :  { %v959_v23 = vadd.f32 %v1042_v1, %v958_v22  ;;  %v1290_v53 = vpop.f32.mrb[38].mxu1 }
 0x514   :  { %987 = vst [vmem:[#allocation11 + $0x70] sm:$0xff] %v967_v52  ;;  %v970_v24 = vadd.f32 %v1290_v53, %v1042_v1  ;;  %v961_v25 = vpop.f32.mrb[39].mxu1 }
 0x515   :  { %985 = vst [vmem:[#allocation11 + $0x60] sm:$0xff] %v959_v23  ;;  %v962_v26 = vadd.f32 %v1042_v1, %v961_v25 }
 0x516   :  { %988 = vst [vmem:[#allocation11 + $0x78] sm:$0xff] %v970_v24 }
 0x517   :  { %986 = vst [vmem:[#allocation11 + $0x68] sm:$0xff] %v962_v26 }
 0x518   :  { %1478 = shalt.err (!%p1475_p2)
}
 0x519   :  { %s1479_s26 = scalar_lea.hbm %s1702_s8, 2048 }
 0x51a   :  { %p1480_p3 = scmp.ne.s32.totalorder %s1702_s8, %s1479_s26  ;;  %p1483_p4 = scmp.lt.u32.totalorder %s1479_s26, %s1702_s8 }
 0x51c   :  { %p1485_p5 = pnand %p1483_p4, %p1480_p3 }
 0x51e   :  { %1488 = shalt.err (!%p1485_p5)
}
 0x51f   :  { %s1505_s0 = smov 128   ;;  %s1506_s9 = smov 8  }
 0x520   :  { %1000 = dma.vmem_to_hbm [thread:$0]  %s995_s22, 2048, %s1702_s8, [#allocation4], %s1505_s0, %s1505_s0, %s1506_s9  }
 0x521   :  { %1495 = dma.done.wait [#allocation4], 2048  }
 0x522   :  { %1496 = vsyncadd [#allocation4], 4294965248 }
 0x523   :  { %1004 = vsyncpa [#allocation3], 1 }
 0x524   :  { %1005 = vsyncpa [#allocation6], 1 }
 0x525   :  { %1006 = vsyncpa [#allocation9], 1 }
 0x526   :  { %1007 = vsyncpa [#allocation4], 1 }

</bundles_post_ra>
